<compile_context>
chip_gen: v7x
topology: tpu7x:2x2x1
jax: 0.10.0
libtpu: 0.0.40
codegen_flags: <defaults>
</compile_context>

<pallas_src>
import functools

import jax
import jax.numpy as jnp
from jax.experimental import pallas as pl
from jax.experimental.pallas import tpu as pltpu  # noqa: F401  (TPU backend)


def _sigmoid(z):
    # Explicit formula; exp lowers to the EUP (separate bundle slot).
    return 1.0 / (1.0 + jnp.exp(-z))


def _fep_kernel(alpha, unimix, T, B,
                x_ref, u_ref, wih_ref, whh_ref, whht_ref,
                spikes_ref, preds_ref, probs_ref):
    """Full T-step FepNet recurrence in one invocation.

    x_ref:      (T*B, D)      time-major inputs (rows = t*B + b)
    u_ref:      (T*B, H)      uniform(0,1) randoms for Bernoulli sampling
    wih_ref:    (D, H)
    whh_ref:    (H, H)
    whht_ref:   (H, H)        w_hh transposed (precomputed in wrapper)
    spikes_ref: ((T+1)*B, H)  out: zero initial state + T sampled spikes
    preds_ref:  (T*B, H)      out
    probs_ref:  (T*B, H)      out
    """
    one_m_alpha = 1.0 - alpha
    # Fold (1 - alpha) into the weights once (tiny one-time VPU work), so the
    # per-step update is just  alpha*prob + input_s[t] + spike @ w_hh_s.
    w_ih_s = wih_ref[...] * one_m_alpha
    w_hh_s = whh_ref[...] * one_m_alpha
    w_hh_t = whht_ref[...]

    # Hoisted input projection for all timesteps at once (one MXU pass,
    # outside the sequential dependency chain).
    input_terms = jnp.dot(x_ref[...], w_ih_s, preferred_element_type=jnp.float32)

    H = w_hh_s.shape[0]
    prob = jnp.zeros((B, H), jnp.float32)
    spike = jnp.zeros((B, H), jnp.float32)

    # Initial (zero) spike state -> row block 0 of the spikes output.
    spikes_ref[pl.ds(0, B), :] = spike

    # Sequential recurrence; fully unrolled (T is a small static constant),
    # everything stays in vregs/VMEM across steps.  All slice offsets are
    # static multiples of B (=8) -> sublane-aligned.
    for t in range(T):
        pre = (input_terms[t * B:(t + 1) * B, :]
               + jnp.dot(spike, w_hh_s, preferred_element_type=jnp.float32))
        prob = _sigmoid(alpha * prob + pre)
        prob = (1.0 - unimix) * prob + unimix * 0.5   # unimix with uniform=0.5
        # Bernoulli(prob) sample.  The straight-through term
        # spike + (prob - prob.detach()) is a no-op in the forward value.
        spike = (u_ref[pl.ds(t * B, B), :] < prob).astype(jnp.float32)
        probs_ref[pl.ds(t * B, B), :] = prob
        spikes_ref[pl.ds((t + 1) * B, B), :] = spike

    # Batched prediction over all timesteps: sigmoid(prob_t @ w_hh.T).
    preds_ref[...] = _sigmoid(
        jnp.dot(probs_ref[...], w_hh_t, preferred_element_type=jnp.float32))


def fep_net_forward(inputs, w_ih, w_hh, *, alpha, unimix=0.01, key=None):
    """FepNet forward pass.

    inputs: [T, B, D] float32 (time-major, like the PyTorch module).
    Returns (out, state):
      out   = {'spikes': [T+1,B,H], 'preds': [T,B,H], 'probs': [T,B,H]}
      state = {'prob': [B,H], 'spike': [B,H]}
    """
    T, B, D = inputs.shape
    H = w_hh.shape[0]
    assert w_ih.shape == (D, H) and w_hh.shape == (H, H)

    if key is None:
        key = jax.random.PRNGKey(0)
    # Uniforms driving the Bernoulli samples (one per (t, b, h)).
    # TODO(synk): PyTorch samples with its own global RNG; exact sample streams
    # cannot match, only the Bernoulli(prob) distribution does.
    uniforms = jax.random.uniform(key, (T * B, H), dtype=jnp.float32)

    x2d = inputs.reshape(T * B, D).astype(jnp.float32)   # free row-major view
    w_ih = w_ih.astype(jnp.float32)
    w_hh = w_hh.astype(jnp.float32)
    w_hh_t = w_hh.T                                       # transpose once, outside kernel

    kernel = functools.partial(_fep_kernel, float(alpha), float(unimix), T, B)

    spikes2d, preds2d, probs2d = pl.pallas_call(
        kernel,
        grid=(1,),
        in_specs=[
            pl.BlockSpec((T * B, D), lambda i: (0, 0)),        # x
            pl.BlockSpec((T * B, H), lambda i: (0, 0)),        # uniforms
            pl.BlockSpec((D, H), lambda i: (0, 0)),            # w_ih
            pl.BlockSpec((H, H), lambda i: (0, 0)),            # w_hh
            pl.BlockSpec((H, H), lambda i: (0, 0)),            # w_hh.T
        ],
        out_specs=(
            pl.BlockSpec(((T + 1) * B, H), lambda i: (0, 0)),  # spikes
            pl.BlockSpec((T * B, H), lambda i: (0, 0)),        # preds
            pl.BlockSpec((T * B, H), lambda i: (0, 0)),        # probs
        ),
        out_shape=(
            jax.ShapeDtypeStruct(((T + 1) * B, H), jnp.float32),
            jax.ShapeDtypeStruct((T * B, H), jnp.float32),
            jax.ShapeDtypeStruct((T * B, H), jnp.float32),
        ),
        compiler_params=pltpu.CompilerParams(
            dimension_semantics=("arbitrary",)),
    )(x2d, uniforms, w_ih, w_hh, w_hh_t)

    # Free row-major reshape views back to the module's [T(,+1), B, H] layout.
    spikes = spikes2d.reshape(T + 1, B, H)
    preds = preds2d.reshape(T, B, H)
    probs = probs2d.reshape(T, B, H)

    out = {"spikes": spikes, "preds": preds, "probs": probs}
    # PyTorch carries the post-unimix prob and the sampled spike as state.
    state = {"prob": probs[-1], "spike": spikes[-1]}
    return out, state


if __name__ == "__main__":
    import numpy as np

    # Small shapes consistent with the module: seq T=8, batch B=8,
    # input_size D=16, hidden_size H=32.
    T, B, D, H = 8, 8, 16, 32
    alpha = 0.5
    unimix = 0.01

    key = jax.random.PRNGKey(0)
    k_x, k_ih, k_hh, k_u = jax.random.split(key, 4)
    inputs = jax.random.normal(k_x, (T, B, D), dtype=jnp.float32)
    # torch.randn analogue for the parameters.
    w_ih = jax.random.normal(k_ih, (D, H), dtype=jnp.float32)
    w_hh = jax.random.normal(k_hh, (H, H), dtype=jnp.float32)

    out, state = fep_net_forward(inputs, w_ih, w_hh,
                                 alpha=alpha, unimix=unimix, key=k_u)
    jax.block_until_ready(out["spikes"])
    jax.block_until_ready(out["preds"])
    jax.block_until_ready(out["probs"])

    # Contract checks against the PyTorch module.
    assert out["spikes"].shape == (T + 1, B, H)
    assert out["preds"].shape == (T, B, H)
    assert out["probs"].shape == (T, B, H)
    assert state["prob"].shape == (B, H)
    assert state["spike"].shape == (B, H)

    spikes = np.asarray(out["spikes"])
    probs = np.asarray(out["probs"])
    preds = np.asarray(out["preds"])
    assert np.all(spikes[0] == 0.0)                    # prepended zero state
    assert np.all((spikes == 0.0) | (spikes == 1.0))   # Bernoulli samples
    assert np.all(probs >= unimix * 0.5 - 1e-6)        # unimix lower bound
    assert np.all(probs <= 1.0 - unimix * 0.5 + 1e-6)  # unimix upper bound
    assert np.isfinite(preds).all() and np.all(preds > 0.0) and np.all(preds < 1.0)
    assert np.allclose(np.asarray(state["prob"]), probs[-1])
    assert np.allclose(np.asarray(state["spike"]), spikes[-1])

    # Pure-JAX reference (same uniforms) to check the recurrence exactly.
    def ref_forward(x, u, wih, whh):
        prob = jnp.zeros((B, H), jnp.float32)
        spike = jnp.zeros((B, H), jnp.float32)
        sp, pr, pd = [spike], [], []
        for t in range(T):
            pre = x[t] @ wih + spike @ whh
            prob = jax.nn.sigmoid(alpha * prob + (1 - alpha) * pre)
            prob = (1 - unimix) * prob + unimix * 0.5
            pred = jax.nn.sigmoid(prob @ whh.T)
            spike = (u[t * B:(t + 1) * B] < prob).astype(jnp.float32)
            sp.append(spike); pr.append(prob); pd.append(pred)
        return jnp.stack(sp), jnp.stack(pd), jnp.stack(pr)

    u_ref = jax.random.uniform(k_u, (T * B, H), dtype=jnp.float32)
    sp_r, pd_r, pr_r = ref_forward(inputs, u_ref, w_ih, w_hh)
    np.testing.assert_allclose(spikes, np.asarray(sp_r), atol=1e-5)
    np.testing.assert_allclose(probs, np.asarray(pr_r), atol=1e-5)
    np.testing.assert_allclose(preds, np.asarray(pd_r), atol=1e-5)

    print("KERNEL_OK")
</pallas_src>

<mosaic_0001>
module attributes {stable_mosaic.version = 11 : i64} {
  func.func @_fep_kernel(%arg0: i32, %arg1: memref<64x16xf32, #tpu.memory_space<vmem>>, %arg2: memref<64x32xf32, #tpu.memory_space<vmem>>, %arg3: memref<16x32xf32, #tpu.memory_space<vmem>>, %arg4: memref<32x32xf32, #tpu.memory_space<vmem>>, %arg5: memref<32x32xf32, #tpu.memory_space<vmem>>, %arg6: memref<72x32xf32, #tpu.memory_space<vmem>>, %arg7: memref<64x32xf32, #tpu.memory_space<vmem>>, %arg8: memref<64x32xf32, #tpu.memory_space<vmem>>) attributes {dimension_semantics = [#tpu.dimension_semantics<arbitrary>], iteration_bounds = array<i64: 1>, scalar_prefetch = 0 : i64, scratch_operands = 0 : i64, tpu.core_type = #tpu.core_type<tc>, window_params = [{pipeline_mode = #tpu.pipeline_mode<synchronous>, transform_indices = @transform_0, window_bounds = array<i64: 64, 16>}, {pipeline_mode = #tpu.pipeline_mode<synchronous>, transform_indices = @transform_1, window_bounds = array<i64: 64, 32>}, {pipeline_mode = #tpu.pipeline_mode<synchronous>, transform_indices = @transform_2, window_bounds = array<i64: 16, 32>}, {pipeline_mode = #tpu.pipeline_mode<synchronous>, transform_indices = @transform_3, window_bounds = array<i64: 32, 32>}, {pipeline_mode = #tpu.pipeline_mode<synchronous>, transform_indices = @transform_4, window_bounds = array<i64: 32, 32>}, {pipeline_mode = #tpu.pipeline_mode<synchronous>, transform_indices = @transform_5, window_bounds = array<i64: 72, 32>}, {pipeline_mode = #tpu.pipeline_mode<synchronous>, transform_indices = @transform_6, window_bounds = array<i64: 64, 32>}, {pipeline_mode = #tpu.pipeline_mode<synchronous>, transform_indices = @transform_7, window_bounds = array<i64: 64, 32>}]} {
    %c0 = arith.constant 0 : index
    %c0_0 = arith.constant 0 : index
    %0 = vector.load %arg3[%c0, %c0_0] : memref<16x32xf32, #tpu.memory_space<vmem>>, vector<16x32xf32>
    %cst = arith.constant 5.000000e-01 : f32
    %1 = vector.broadcast %cst : f32 to vector<16x32xf32>
    %2 = arith.mulf %0, %1 : vector<16x32xf32>
    %c0_1 = arith.constant 0 : index
    %c0_2 = arith.constant 0 : index
    %3 = vector.load %arg4[%c0_1, %c0_2] : memref<32x32xf32, #tpu.memory_space<vmem>>, vector<32x32xf32>
    %cst_3 = arith.constant 5.000000e-01 : f32
    %4 = vector.broadcast %cst_3 : f32 to vector<32x32xf32>
    %5 = arith.mulf %3, %4 : vector<32x32xf32>
    %c0_4 = arith.constant 0 : index
    %c0_5 = arith.constant 0 : index
    %6 = vector.load %arg5[%c0_4, %c0_5] : memref<32x32xf32, #tpu.memory_space<vmem>>, vector<32x32xf32>
    %c0_6 = arith.constant 0 : index
    %c0_7 = arith.constant 0 : index
    %7 = vector.load %arg1[%c0_6, %c0_7] : memref<64x16xf32, #tpu.memory_space<vmem>>, vector<64x16xf32>
    %cst_8 = arith.constant dense<0.000000e+00> : vector<64x32xf32>
    %8 = tpu.matmul %7, %2, %cst_8 {dimension_numbers = #tpu.dot_dimension_numbers<[1], [0], [0], [1], [0, 0, 1, 1], [], []>} : vector<64x16xf32>, vector<16x32xf32>, vector<64x32xf32> -> vector<64x32xf32>
    %cst_9 = arith.constant 0.000000e+00 : f32
    %9 = vector.broadcast %cst_9 : f32 to vector<8x32xf32>
    %cst_10 = arith.constant 0.000000e+00 : f32
    %10 = vector.broadcast %cst_10 : f32 to vector<8x32xf32>
    %c0_11 = arith.constant 0 : index
    %c0_12 = arith.constant 0 : index
    %11 = vector.load %arg6[%c0_11, %c0_12] : memref<72x32xf32, #tpu.memory_space<vmem>>, vector<8x32xf32>
    tpu.vector_store %arg6[%c0_11, %c0_12], %10 {strides = array<i32>} : memref<72x32xf32, #tpu.memory_space<vmem>>, vector<8x32xf32>,
    %12 = vector.extract_strided_slice %8 {offsets = [0, 0], sizes = [8, 32], strides = [1, 1]} : vector<64x32xf32> to vector<8x32xf32>
    %cst_13 = arith.constant dense<0.000000e+00> : vector<8x32xf32>
    %13 = tpu.matmul %10, %5, %cst_13 {dimension_numbers = #tpu.dot_dimension_numbers<[1], [0], [0], [1], [0, 0, 1, 1], [], []>} : vector<8x32xf32>, vector<32x32xf32>, vector<8x32xf32> -> vector<8x32xf32>
    %14 = arith.addf %12, %13 : vector<8x32xf32>
    %cst_14 = arith.constant 5.000000e-01 : f32
    %15 = vector.broadcast %cst_14 : f32 to vector<8x32xf32>
    %16 = arith.mulf %15, %9 : vector<8x32xf32>
    %17 = arith.addf %16, %14 : vector<8x32xf32>
    %cst_15 = arith.constant 0.000000e+00 : f32
    %18 = vector.broadcast %cst_15 : f32 to vector<8x32xf32>
    %19 = arith.subf %18, %17 : vector<8x32xf32>
    %20 = math.exp %19 : vector<8x32xf32>
    %cst_16 = arith.constant 1.000000e+00 : f32
    %21 = vector.broadcast %cst_16 : f32 to vector<8x32xf32>
    %22 = arith.addf %21, %20 : vector<8x32xf32>
    %cst_17 = arith.constant 1.000000e+00 : f32
    %23 = vector.broadcast %cst_17 : f32 to vector<8x32xf32>
    %24 = arith.divf %23, %22 : vector<8x32xf32>
    %cst_18 = arith.constant 9.900000e-01 : f32
    %25 = vector.broadcast %cst_18 : f32 to vector<8x32xf32>
    %26 = arith.mulf %25, %24 : vector<8x32xf32>
    %cst_19 = arith.constant 5.000000e-03 : f32
    %27 = vector.broadcast %cst_19 : f32 to vector<8x32xf32>
    %28 = arith.addf %26, %27 : vector<8x32xf32>
    %c0_20 = arith.constant 0 : index
    %c0_21 = arith.constant 0 : index
    %29 = vector.load %arg2[%c0_20, %c0_21] : memref<64x32xf32, #tpu.memory_space<vmem>>, vector<8x32xf32>
    %30 = arith.cmpf olt, %29, %28 : vector<8x32xf32>
    %31 = arith.extui %30 : vector<8x32xi1> to vector<8x32xi32>
    %32 = arith.sitofp %31 : vector<8x32xi32> to vector<8x32xf32>
    %c0_22 = arith.constant 0 : index
    %c0_23 = arith.constant 0 : index
    %33 = vector.load %arg8[%c0_22, %c0_23] : memref<64x32xf32, #tpu.memory_space<vmem>>, vector<8x32xf32>
    tpu.vector_store %arg8[%c0_22, %c0_23], %28 {strides = array<i32>} : memref<64x32xf32, #tpu.memory_space<vmem>>, vector<8x32xf32>,
    %c8 = arith.constant 8 : index
    %c0_24 = arith.constant 0 : index
    %34 = vector.load %arg6[%c8, %c0_24] : memref<72x32xf32, #tpu.memory_space<vmem>>, vector<8x32xf32>
    tpu.vector_store %arg6[%c8, %c0_24], %32 {strides = array<i32>} : memref<72x32xf32, #tpu.memory_space<vmem>>, vector<8x32xf32>,
    %35 = vector.extract_strided_slice %8 {offsets = [8, 0], sizes = [8, 32], strides = [1, 1]} : vector<64x32xf32> to vector<8x32xf32>
    %cst_25 = arith.constant dense<0.000000e+00> : vector<8x32xf32>
    %36 = tpu.matmul %32, %5, %cst_25 {dimension_numbers = #tpu.dot_dimension_numbers<[1], [0], [0], [1], [0, 0, 1, 1], [], []>} : vector<8x32xf32>, vector<32x32xf32>, vector<8x32xf32> -> vector<8x32xf32>
    %37 = arith.addf %35, %36 : vector<8x32xf32>
    %cst_26 = arith.constant 5.000000e-01 : f32
    %38 = vector.broadcast %cst_26 : f32 to vector<8x32xf32>
    %39 = arith.mulf %38, %28 : vector<8x32xf32>
    %40 = arith.addf %39, %37 : vector<8x32xf32>
    %cst_27 = arith.constant 0.000000e+00 : f32
    %41 = vector.broadcast %cst_27 : f32 to vector<8x32xf32>
    %42 = arith.subf %41, %40 : vector<8x32xf32>
    %43 = math.exp %42 : vector<8x32xf32>
    %cst_28 = arith.constant 1.000000e+00 : f32
    %44 = vector.broadcast %cst_28 : f32 to vector<8x32xf32>
    %45 = arith.addf %44, %43 : vector<8x32xf32>
    %cst_29 = arith.constant 1.000000e+00 : f32
    %46 = vector.broadcast %cst_29 : f32 to vector<8x32xf32>
    %47 = arith.divf %46, %45 : vector<8x32xf32>
    %cst_30 = arith.constant 9.900000e-01 : f32
    %48 = vector.broadcast %cst_30 : f32 to vector<8x32xf32>
    %49 = arith.mulf %48, %47 : vector<8x32xf32>
    %cst_31 = arith.constant 5.000000e-03 : f32
    %50 = vector.broadcast %cst_31 : f32 to vector<8x32xf32>
    %51 = arith.addf %49, %50 : vector<8x32xf32>
    %c8_32 = arith.constant 8 : index
    %c0_33 = arith.constant 0 : index
    %52 = vector.load %arg2[%c8_32, %c0_33] : memref<64x32xf32, #tpu.memory_space<vmem>>, vector<8x32xf32>
    %53 = arith.cmpf olt, %52, %51 : vector<8x32xf32>
    %54 = arith.extui %53 : vector<8x32xi1> to vector<8x32xi32>
    %55 = arith.sitofp %54 : vector<8x32xi32> to vector<8x32xf32>
    %c8_34 = arith.constant 8 : index
    %c0_35 = arith.constant 0 : index
    %56 = vector.load %arg8[%c8_34, %c0_35] : memref<64x32xf32, #tpu.memory_space<vmem>>, vector<8x32xf32>
    tpu.vector_store %arg8[%c8_34, %c0_35], %51 {strides = array<i32>} : memref<64x32xf32, #tpu.memory_space<vmem>>, vector<8x32xf32>,
    %c16 = arith.constant 16 : index
    %c0_36 = arith.constant 0 : index
    %57 = vector.load %arg6[%c16, %c0_36] : memref<72x32xf32, #tpu.memory_space<vmem>>, vector<8x32xf32>
    tpu.vector_store %arg6[%c16, %c0_36], %55 {strides = array<i32>} : memref<72x32xf32, #tpu.memory_space<vmem>>, vector<8x32xf32>,
    %58 = vector.extract_strided_slice %8 {offsets = [16, 0], sizes = [8, 32], strides = [1, 1]} : vector<64x32xf32> to vector<8x32xf32>
    %cst_37 = arith.constant dense<0.000000e+00> : vector<8x32xf32>
    %59 = tpu.matmul %55, %5, %cst_37 {dimension_numbers = #tpu.dot_dimension_numbers<[1], [0], [0], [1], [0, 0, 1, 1], [], []>} : vector<8x32xf32>, vector<32x32xf32>, vector<8x32xf32> -> vector<8x32xf32>
    %60 = arith.addf %58, %59 : vector<8x32xf32>
    %cst_38 = arith.constant 5.000000e-01 : f32
    %61 = vector.broadcast %cst_38 : f32 to vector<8x32xf32>
    %62 = arith.mulf %61, %51 : vector<8x32xf32>
    %63 = arith.addf %62, %60 : vector<8x32xf32>
    %cst_39 = arith.constant 0.000000e+00 : f32
    %64 = vector.broadcast %cst_39 : f32 to vector<8x32xf32>
    %65 = arith.subf %64, %63 : vector<8x32xf32>
    %66 = math.exp %65 : vector<8x32xf32>
    %cst_40 = arith.constant 1.000000e+00 : f32
    %67 = vector.broadcast %cst_40 : f32 to vector<8x32xf32>
    %68 = arith.addf %67, %66 : vector<8x32xf32>
    %cst_41 = arith.constant 1.000000e+00 : f32
    %69 = vector.broadcast %cst_41 : f32 to vector<8x32xf32>
    %70 = arith.divf %69, %68 : vector<8x32xf32>
    %cst_42 = arith.constant 9.900000e-01 : f32
    %71 = vector.broadcast %cst_42 : f32 to vector<8x32xf32>
    %72 = arith.mulf %71, %70 : vector<8x32xf32>
    %cst_43 = arith.constant 5.000000e-03 : f32
    %73 = vector.broadcast %cst_43 : f32 to vector<8x32xf32>
    %74 = arith.addf %72, %73 : vector<8x32xf32>
    %c16_44 = arith.constant 16 : index
    %c0_45 = arith.constant 0 : index
    %75 = vector.load %arg2[%c16_44, %c0_45] : memref<64x32xf32, #tpu.memory_space<vmem>>, vector<8x32xf32>
    %76 = arith.cmpf olt, %75, %74 : vector<8x32xf32>
    %77 = arith.extui %76 : vector<8x32xi1> to vector<8x32xi32>
    %78 = arith.sitofp %77 : vector<8x32xi32> to vector<8x32xf32>
    %c16_46 = arith.constant 16 : index
    %c0_47 = arith.constant 0 : index
    %79 = vector.load %arg8[%c16_46, %c0_47] : memref<64x32xf32, #tpu.memory_space<vmem>>, vector<8x32xf32>
    tpu.vector_store %arg8[%c16_46, %c0_47], %74 {strides = array<i32>} : memref<64x32xf32, #tpu.memory_space<vmem>>, vector<8x32xf32>,
    %c24 = arith.constant 24 : index
    %c0_48 = arith.constant 0 : index
    %80 = vector.load %arg6[%c24, %c0_48] : memref<72x32xf32, #tpu.memory_space<vmem>>, vector<8x32xf32>
    tpu.vector_store %arg6[%c24, %c0_48], %78 {strides = array<i32>} : memref<72x32xf32, #tpu.memory_space<vmem>>, vector<8x32xf32>,
    %81 = vector.extract_strided_slice %8 {offsets = [24, 0], sizes = [8, 32], strides = [1, 1]} : vector<64x32xf32> to vector<8x32xf32>
    %cst_49 = arith.constant dense<0.000000e+00> : vector<8x32xf32>
    %82 = tpu.matmul %78, %5, %cst_49 {dimension_numbers = #tpu.dot_dimension_numbers<[1], [0], [0], [1], [0, 0, 1, 1], [], []>} : vector<8x32xf32>, vector<32x32xf32>, vector<8x32xf32> -> vector<8x32xf32>
    %83 = arith.addf %81, %82 : vector<8x32xf32>
    %cst_50 = arith.constant 5.000000e-01 : f32
    %84 = vector.broadcast %cst_50 : f32 to vector<8x32xf32>
    %85 = arith.mulf %84, %74 : vector<8x32xf32>
    %86 = arith.addf %85, %83 : vector<8x32xf32>
    %cst_51 = arith.constant 0.000000e+00 : f32
    %87 = vector.broadcast %cst_51 : f32 to vector<8x32xf32>
    %88 = arith.subf %87, %86 : vector<8x32xf32>
    %89 = math.exp %88 : vector<8x32xf32>
    %cst_52 = arith.constant 1.000000e+00 : f32
    %90 = vector.broadcast %cst_52 : f32 to vector<8x32xf32>
    %91 = arith.addf %90, %89 : vector<8x32xf32>
    %cst_53 = arith.constant 1.000000e+00 : f32
    %92 = vector.broadcast %cst_53 : f32 to vector<8x32xf32>
    %93 = arith.divf %92, %91 : vector<8x32xf32>
    %cst_54 = arith.constant 9.900000e-01 : f32
    %94 = vector.broadcast %cst_54 : f32 to vector<8x32xf32>
    %95 = arith.mulf %94, %93 : vector<8x32xf32>
    %cst_55 = arith.constant 5.000000e-03 : f32
    %96 = vector.broadcast %cst_55 : f32 to vector<8x32xf32>
    %97 = arith.addf %95, %96 : vector<8x32xf32>
    %c24_56 = arith.constant 24 : index
    %c0_57 = arith.constant 0 : index
    %98 = vector.load %arg2[%c24_56, %c0_57] : memref<64x32xf32, #tpu.memory_space<vmem>>, vector<8x32xf32>
    %99 = arith.cmpf olt, %98, %97 : vector<8x32xf32>
    %100 = arith.extui %99 : vector<8x32xi1> to vector<8x32xi32>
    %101 = arith.sitofp %100 : vector<8x32xi32> to vector<8x32xf32>
    %c24_58 = arith.constant 24 : index
    %c0_59 = arith.constant 0 : index
    %102 = vector.load %arg8[%c24_58, %c0_59] : memref<64x32xf32, #tpu.memory_space<vmem>>, vector<8x32xf32>
    tpu.vector_store %arg8[%c24_58, %c0_59], %97 {strides = array<i32>} : memref<64x32xf32, #tpu.memory_space<vmem>>, vector<8x32xf32>,
    %c32 = arith.constant 32 : index
    %c0_60 = arith.constant 0 : index
    %103 = vector.load %arg6[%c32, %c0_60] : memref<72x32xf32, #tpu.memory_space<vmem>>, vector<8x32xf32>
    tpu.vector_store %arg6[%c32, %c0_60], %101 {strides = array<i32>} : memref<72x32xf32, #tpu.memory_space<vmem>>, vector<8x32xf32>,
    %104 = vector.extract_strided_slice %8 {offsets = [32, 0], sizes = [8, 32], strides = [1, 1]} : vector<64x32xf32> to vector<8x32xf32>
    %cst_61 = arith.constant dense<0.000000e+00> : vector<8x32xf32>
    %105 = tpu.matmul %101, %5, %cst_61 {dimension_numbers = #tpu.dot_dimension_numbers<[1], [0], [0], [1], [0, 0, 1, 1], [], []>} : vector<8x32xf32>, vector<32x32xf32>, vector<8x32xf32> -> vector<8x32xf32>
    %106 = arith.addf %104, %105 : vector<8x32xf32>
    %cst_62 = arith.constant 5.000000e-01 : f32
    %107 = vector.broadcast %cst_62 : f32 to vector<8x32xf32>
    %108 = arith.mulf %107, %97 : vector<8x32xf32>
    %109 = arith.addf %108, %106 : vector<8x32xf32>
    %cst_63 = arith.constant 0.000000e+00 : f32
    %110 = vector.broadcast %cst_63 : f32 to vector<8x32xf32>
    %111 = arith.subf %110, %109 : vector<8x32xf32>
    %112 = math.exp %111 : vector<8x32xf32>
    %cst_64 = arith.constant 1.000000e+00 : f32
    %113 = vector.broadcast %cst_64 : f32 to vector<8x32xf32>
    %114 = arith.addf %113, %112 : vector<8x32xf32>
    %cst_65 = arith.constant 1.000000e+00 : f32
    %115 = vector.broadcast %cst_65 : f32 to vector<8x32xf32>
    %116 = arith.divf %115, %114 : vector<8x32xf32>
    %cst_66 = arith.constant 9.900000e-01 : f32
    %117 = vector.broadcast %cst_66 : f32 to vector<8x32xf32>
    %118 = arith.mulf %117, %116 : vector<8x32xf32>
    %cst_67 = arith.constant 5.000000e-03 : f32
    %119 = vector.broadcast %cst_67 : f32 to vector<8x32xf32>
    %120 = arith.addf %118, %119 : vector<8x32xf32>
    %c32_68 = arith.constant 32 : index
    %c0_69 = arith.constant 0 : index
    %121 = vector.load %arg2[%c32_68, %c0_69] : memref<64x32xf32, #tpu.memory_space<vmem>>, vector<8x32xf32>
    %122 = arith.cmpf olt, %121, %120 : vector<8x32xf32>
    %123 = arith.extui %122 : vector<8x32xi1> to vector<8x32xi32>
    %124 = arith.sitofp %123 : vector<8x32xi32> to vector<8x32xf32>
    %c32_70 = arith.constant 32 : index
    %c0_71 = arith.constant 0 : index
    %125 = vector.load %arg8[%c32_70, %c0_71] : memref<64x32xf32, #tpu.memory_space<vmem>>, vector<8x32xf32>
    tpu.vector_store %arg8[%c32_70, %c0_71], %120 {strides = array<i32>} : memref<64x32xf32, #tpu.memory_space<vmem>>, vector<8x32xf32>,
    %c40 = arith.constant 40 : index
    %c0_72 = arith.constant 0 : index
    %126 = vector.load %arg6[%c40, %c0_72] : memref<72x32xf32, #tpu.memory_space<vmem>>, vector<8x32xf32>
    tpu.vector_store %arg6[%c40, %c0_72], %124 {strides = array<i32>} : memref<72x32xf32, #tpu.memory_space<vmem>>, vector<8x32xf32>,
    %127 = vector.extract_strided_slice %8 {offsets = [40, 0], sizes = [8, 32], strides = [1, 1]} : vector<64x32xf32> to vector<8x32xf32>
    %cst_73 = arith.constant dense<0.000000e+00> : vector<8x32xf32>
    %128 = tpu.matmul %124, %5, %cst_73 {dimension_numbers = #tpu.dot_dimension_numbers<[1], [0], [0], [1], [0, 0, 1, 1], [], []>} : vector<8x32xf32>, vector<32x32xf32>, vector<8x32xf32> -> vector<8x32xf32>
    %129 = arith.addf %127, %128 : vector<8x32xf32>
    %cst_74 = arith.constant 5.000000e-01 : f32
    %130 = vector.broadcast %cst_74 : f32 to vector<8x32xf32>
    %131 = arith.mulf %130, %120 : vector<8x32xf32>
    %132 = arith.addf %131, %129 : vector<8x32xf32>
    %cst_75 = arith.constant 0.000000e+00 : f32
    %133 = vector.broadcast %cst_75 : f32 to vector<8x32xf32>
    %134 = arith.subf %133, %132 : vector<8x32xf32>
    %135 = math.exp %134 : vector<8x32xf32>
    %cst_76 = arith.constant 1.000000e+00 : f32
    %136 = vector.broadcast %cst_76 : f32 to vector<8x32xf32>
    %137 = arith.addf %136, %135 : vector<8x32xf32>
    %cst_77 = arith.constant 1.000000e+00 : f32
    %138 = vector.broadcast %cst_77 : f32 to vector<8x32xf32>
    %139 = arith.divf %138, %137 : vector<8x32xf32>
    %cst_78 = arith.constant 9.900000e-01 : f32
    %140 = vector.broadcast %cst_78 : f32 to vector<8x32xf32>
    %141 = arith.mulf %140, %139 : vector<8x32xf32>
    %cst_79 = arith.constant 5.000000e-03 : f32
    %142 = vector.broadcast %cst_79 : f32 to vector<8x32xf32>
    %143 = arith.addf %141, %142 : vector<8x32xf32>
    %c40_80 = arith.constant 40 : index
    %c0_81 = arith.constant 0 : index
    %144 = vector.load %arg2[%c40_80, %c0_81] : memref<64x32xf32, #tpu.memory_space<vmem>>, vector<8x32xf32>
    %145 = arith.cmpf olt, %144, %143 : vector<8x32xf32>
    %146 = arith.extui %145 : vector<8x32xi1> to vector<8x32xi32>
    %147 = arith.sitofp %146 : vector<8x32xi32> to vector<8x32xf32>
    %c40_82 = arith.constant 40 : index
    %c0_83 = arith.constant 0 : index
    %148 = vector.load %arg8[%c40_82, %c0_83] : memref<64x32xf32, #tpu.memory_space<vmem>>, vector<8x32xf32>
    tpu.vector_store %arg8[%c40_82, %c0_83], %143 {strides = array<i32>} : memref<64x32xf32, #tpu.memory_space<vmem>>, vector<8x32xf32>,
    %c48 = arith.constant 48 : index
    %c0_84 = arith.constant 0 : index
    %149 = vector.load %arg6[%c48, %c0_84] : memref<72x32xf32, #tpu.memory_space<vmem>>, vector<8x32xf32>
    tpu.vector_store %arg6[%c48, %c0_84], %147 {strides = array<i32>} : memref<72x32xf32, #tpu.memory_space<vmem>>, vector<8x32xf32>,
    %150 = vector.extract_strided_slice %8 {offsets = [48, 0], sizes = [8, 32], strides = [1, 1]} : vector<64x32xf32> to vector<8x32xf32>
    %cst_85 = arith.constant dense<0.000000e+00> : vector<8x32xf32>
    %151 = tpu.matmul %147, %5, %cst_85 {dimension_numbers = #tpu.dot_dimension_numbers<[1], [0], [0], [1], [0, 0, 1, 1], [], []>} : vector<8x32xf32>, vector<32x32xf32>, vector<8x32xf32> -> vector<8x32xf32>
    %152 = arith.addf %150, %151 : vector<8x32xf32>
    %cst_86 = arith.constant 5.000000e-01 : f32
    %153 = vector.broadcast %cst_86 : f32 to vector<8x32xf32>
    %154 = arith.mulf %153, %143 : vector<8x32xf32>
    %155 = arith.addf %154, %152 : vector<8x32xf32>
    %cst_87 = arith.constant 0.000000e+00 : f32
    %156 = vector.broadcast %cst_87 : f32 to vector<8x32xf32>
    %157 = arith.subf %156, %155 : vector<8x32xf32>
    %158 = math.exp %157 : vector<8x32xf32>
    %cst_88 = arith.constant 1.000000e+00 : f32
    %159 = vector.broadcast %cst_88 : f32 to vector<8x32xf32>
    %160 = arith.addf %159, %158 : vector<8x32xf32>
    %cst_89 = arith.constant 1.000000e+00 : f32
    %161 = vector.broadcast %cst_89 : f32 to vector<8x32xf32>
    %162 = arith.divf %161, %160 : vector<8x32xf32>
    %cst_90 = arith.constant 9.900000e-01 : f32
    %163 = vector.broadcast %cst_90 : f32 to vector<8x32xf32>
    %164 = arith.mulf %163, %162 : vector<8x32xf32>
    %cst_91 = arith.constant 5.000000e-03 : f32
    %165 = vector.broadcast %cst_91 : f32 to vector<8x32xf32>
    %166 = arith.addf %164, %165 : vector<8x32xf32>
    %c48_92 = arith.constant 48 : index
    %c0_93 = arith.constant 0 : index
    %167 = vector.load %arg2[%c48_92, %c0_93] : memref<64x32xf32, #tpu.memory_space<vmem>>, vector<8x32xf32>
    %168 = arith.cmpf olt, %167, %166 : vector<8x32xf32>
    %169 = arith.extui %168 : vector<8x32xi1> to vector<8x32xi32>
    %170 = arith.sitofp %169 : vector<8x32xi32> to vector<8x32xf32>
    %c48_94 = arith.constant 48 : index
    %c0_95 = arith.constant 0 : index
    %171 = vector.load %arg8[%c48_94, %c0_95] : memref<64x32xf32, #tpu.memory_space<vmem>>, vector<8x32xf32>
    tpu.vector_store %arg8[%c48_94, %c0_95], %166 {strides = array<i32>} : memref<64x32xf32, #tpu.memory_space<vmem>>, vector<8x32xf32>,
    %c56 = arith.constant 56 : index
    %c0_96 = arith.constant 0 : index
    %172 = vector.load %arg6[%c56, %c0_96] : memref<72x32xf32, #tpu.memory_space<vmem>>, vector<8x32xf32>
    tpu.vector_store %arg6[%c56, %c0_96], %170 {strides = array<i32>} : memref<72x32xf32, #tpu.memory_space<vmem>>, vector<8x32xf32>,
    %173 = vector.extract_strided_slice %8 {offsets = [56, 0], sizes = [8, 32], strides = [1, 1]} : vector<64x32xf32> to vector<8x32xf32>
    %cst_97 = arith.constant dense<0.000000e+00> : vector<8x32xf32>
    %174 = tpu.matmul %170, %5, %cst_97 {dimension_numbers = #tpu.dot_dimension_numbers<[1], [0], [0], [1], [0, 0, 1, 1], [], []>} : vector<8x32xf32>, vector<32x32xf32>, vector<8x32xf32> -> vector<8x32xf32>
    %175 = arith.addf %173, %174 : vector<8x32xf32>
    %cst_98 = arith.constant 5.000000e-01 : f32
    %176 = vector.broadcast %cst_98 : f32 to vector<8x32xf32>
    %177 = arith.mulf %176, %166 : vector<8x32xf32>
    %178 = arith.addf %177, %175 : vector<8x32xf32>
    %cst_99 = arith.constant 0.000000e+00 : f32
    %179 = vector.broadcast %cst_99 : f32 to vector<8x32xf32>
    %180 = arith.subf %179, %178 : vector<8x32xf32>
    %181 = math.exp %180 : vector<8x32xf32>
    %cst_100 = arith.constant 1.000000e+00 : f32
    %182 = vector.broadcast %cst_100 : f32 to vector<8x32xf32>
    %183 = arith.addf %182, %181 : vector<8x32xf32>
    %cst_101 = arith.constant 1.000000e+00 : f32
    %184 = vector.broadcast %cst_101 : f32 to vector<8x32xf32>
    %185 = arith.divf %184, %183 : vector<8x32xf32>
    %cst_102 = arith.constant 9.900000e-01 : f32
    %186 = vector.broadcast %cst_102 : f32 to vector<8x32xf32>
    %187 = arith.mulf %186, %185 : vector<8x32xf32>
    %cst_103 = arith.constant 5.000000e-03 : f32
    %188 = vector.broadcast %cst_103 : f32 to vector<8x32xf32>
    %189 = arith.addf %187, %188 : vector<8x32xf32>
    %c56_104 = arith.constant 56 : index
    %c0_105 = arith.constant 0 : index
    %190 = vector.load %arg2[%c56_104, %c0_105] : memref<64x32xf32, #tpu.memory_space<vmem>>, vector<8x32xf32>
    %191 = arith.cmpf olt, %190, %189 : vector<8x32xf32>
    %192 = arith.extui %191 : vector<8x32xi1> to vector<8x32xi32>
    %193 = arith.sitofp %192 : vector<8x32xi32> to vector<8x32xf32>
    %c56_106 = arith.constant 56 : index
    %c0_107 = arith.constant 0 : index
    %194 = vector.load %arg8[%c56_106, %c0_107] : memref<64x32xf32, #tpu.memory_space<vmem>>, vector<8x32xf32>
    tpu.vector_store %arg8[%c56_106, %c0_107], %189 {strides = array<i32>} : memref<64x32xf32, #tpu.memory_space<vmem>>, vector<8x32xf32>,
    %c64 = arith.constant 64 : index
    %c0_108 = arith.constant 0 : index
    %195 = vector.load %arg6[%c64, %c0_108] : memref<72x32xf32, #tpu.memory_space<vmem>>, vector<8x32xf32>
    tpu.vector_store %arg6[%c64, %c0_108], %193 {strides = array<i32>} : memref<72x32xf32, #tpu.memory_space<vmem>>, vector<8x32xf32>,
    %c0_109 = arith.constant 0 : index
    %c0_110 = arith.constant 0 : index
    %196 = vector.load %arg8[%c0_109, %c0_110] : memref<64x32xf32, #tpu.memory_space<vmem>>, vector<64x32xf32>
    %cst_111 = arith.constant dense<0.000000e+00> : vector<64x32xf32>
    %197 = tpu.matmul %196, %6, %cst_111 {dimension_numbers = #tpu.dot_dimension_numbers<[1], [0], [0], [1], [0, 0, 1, 1], [], []>} : vector<64x32xf32>, vector<32x32xf32>, vector<64x32xf32> -> vector<64x32xf32>
    %cst_112 = arith.constant 0.000000e+00 : f32
    %198 = vector.broadcast %cst_112 : f32 to vector<64x32xf32>
    %199 = arith.subf %198, %197 : vector<64x32xf32>
    %200 = math.exp %199 : vector<64x32xf32>
    %cst_113 = arith.constant 1.000000e+00 : f32
    %201 = vector.broadcast %cst_113 : f32 to vector<64x32xf32>
    %202 = arith.addf %201, %200 : vector<64x32xf32>
    %cst_114 = arith.constant 1.000000e+00 : f32
    %203 = vector.broadcast %cst_114 : f32 to vector<64x32xf32>
    %204 = arith.divf %203, %202 : vector<64x32xf32>
    %c0_115 = arith.constant 0 : index
    %c0_116 = arith.constant 0 : index
    %205 = vector.load %arg7[%c0_115, %c0_116] : memref<64x32xf32, #tpu.memory_space<vmem>>, vector<64x32xf32>
    tpu.vector_store %arg7[%c0_115, %c0_116], %204 {strides = array<i32>} : memref<64x32xf32, #tpu.memory_space<vmem>>, vector<64x32xf32>,
    return
  }
  func.func @transform_0(%arg0: i32) -> (i32, i32) {
    %c0_i32 = arith.constant 0 : i32
    %c0_i32_0 = arith.constant 0 : i32
    %c0_i32_1 = arith.constant 0 : i32
    return %c0_i32, %c0_i32_0 : i32, i32
  }
  func.func @transform_1(%arg0: i32) -> (i32, i32) {
    %c0_i32 = arith.constant 0 : i32
    %c0_i32_0 = arith.constant 0 : i32
    %c0_i32_1 = arith.constant 0 : i32
    return %c0_i32, %c0_i32_0 : i32, i32
  }
  func.func @transform_2(%arg0: i32) -> (i32, i32) {
    %c0_i32 = arith.constant 0 : i32
    %c0_i32_0 = arith.constant 0 : i32
    %c0_i32_1 = arith.constant 0 : i32
    return %c0_i32, %c0_i32_0 : i32, i32
  }
  func.func @transform_3(%arg0: i32) -> (i32, i32) {
    %c0_i32 = arith.constant 0 : i32
    %c0_i32_0 = arith.constant 0 : i32
    %c0_i32_1 = arith.constant 0 : i32
    return %c0_i32, %c0_i32_0 : i32, i32
  }
  func.func @transform_4(%arg0: i32) -> (i32, i32) {
    %c0_i32 = arith.constant 0 : i32
    %c0_i32_0 = arith.constant 0 : i32
    %c0_i32_1 = arith.constant 0 : i32
    return %c0_i32, %c0_i32_0 : i32, i32
  }
  func.func @transform_5(%arg0: i32) -> (i32, i32) {
    %c0_i32 = arith.constant 0 : i32
    %c0_i32_0 = arith.constant 0 : i32
    %c0_i32_1 = arith.constant 0 : i32
    return %c0_i32, %c0_i32_0 : i32, i32
  }
  func.func @transform_6(%arg0: i32) -> (i32, i32) {
    %c0_i32 = arith.constant 0 : i32
    %c0_i32_0 = arith.constant 0 : i32
    %c0_i32_1 = arith.constant 0 : i32
    return %c0_i32, %c0_i32_0 : i32, i32
  }
  func.func @transform_7(%arg0: i32) -> (i32, i32) {
    %c0_i32 = arith.constant 0 : i32
    %c0_i32_0 = arith.constant 0 : i32
    %c0_i32_1 = arith.constant 0 : i32
    return %c0_i32, %c0_i32_0 : i32, i32
  }
}

</mosaic_0001>

<bundles_post_ra>
// kernel: tpu_custom_call.1
= control target key start
LH: loop header
LB: loop body
LE: loop exit
PB: predicated region body
PF: predicated region fallthrough
CT: control target
= control target key end

     0   :  { %vm47_vm0 = vcmask 130048   ;;  %v1449_v18 = vmov 0.0|0.0   ;;  %vm1450_vm1 = vmmov 0   ;;  %v1451_v22 = vmov 0.0   ;;  %s1791_s2 = inlined_call_operand.vmem [shape: f32[16,32], index: 2, kind: input, shape index: {}]   ;;  %s1792_s0 = inlined_call_operand.vmem [shape: f32[64,16], index: 0, kind: input, shape index: {}]   ;;  %s1793_s3 = inlined_call_operand.vmem [shape: f32[32,32], index: 3, kind: input, shape index: {}]   ;;  %s1794_s5 = inlined_call_operand.vmem [shape: f32[72,32], index: 5, kind: output, shape index: {0}]   ;;  %s1795_s1 = inlined_call_operand.vmem [shape: f32[64,32], index: 1, kind: input, shape index: {}]   ;;  %s1796_s7 = inlined_call_operand.vmem [shape: f32[64,32], index: 7, kind: output, shape index: {2}]   ;;  %s1797_s4 = inlined_call_operand.vmem [shape: f32[32,32], index: 4, kind: input, shape index: {}]   ;;  %s1798_s6 = inlined_call_operand.vmem [shape: f32[64,32], index: 6, kind: output, shape index: {1}]  }
   0x1   :  { %v23_v0 = vld [vmem:[%s1791_s2] sm:$0xff]  ;;  %v24_v1 = vld [vmem:[%s1791_s2 + $0x8] sm:$0xff]  ;;  %v29_v10 = vld [vmem:[%s1793_s3 + $0x10] sm:$0xff]  ;;  %vm177_vm2 = vcmask 261120  }
   0x2   :  { %v43_v2 = vld [vmem:[%s1792_s0 + $0x20] sm:$0xff]  ;;  %v25_v3 = vmul.f32 0.5, %v23_v0  ;;  %v26_v4 = vmul.f32 0.5, %v24_v1  ;;  %v28_v6 = vld [vmem:[%s1793_s3 + $0x8] sm:$0xff]  ;;  %v30_v11 = vld [vmem:[%s1793_s3 + $0x18] sm:$0xff]  ;;  %v33_v15 = vmul.f32 0.5, %v29_v10 }
   0x3   :  { %1206 = vmatprep.mubr.msk.f32.mxu1 %vm47_vm0, %v43_v2  ;;  %v27_v5 = vld [vmem:[%s1793_s3] sm:$0xff]  ;;  %v32_v8 = vmul.f32 0.5, %v28_v6  ;;  %v44_v13 = vld [vmem:[%s1792_s0 + $0x28] sm:$0xff]  ;;  %v34_v16 = vmul.f32 0.5, %v30_v11  ;;  %v45_v19 = vld [vmem:[%s1792_s0 + $0x30] sm:$0xff]  ;;  %178 = vst.msk [vmem:[%s1794_s5] sm:$0xff] %vm177_vm2, %v1451_v22 }
   0x4   :  { %v31_v7 = vmul.f32 0.5, %v27_v5  ;;  %v1320_v9 = vpack.c.bf16 %v26_v4, %v25_v3  ;;  %v39_v12 = vld [vmem:[%s1792_s0] sm:$0xff]  ;;  %v40_v17 = vld [vmem:[%s1792_s0 + $0x8] sm:$0xff]  ;;  %v46_v20 = vld [vmem:[%s1792_s0 + $0x38] sm:$0xff] }
   0x5   :  { %1200 = vmatprep.mubr.msk.f32.mxu0 %vm47_vm0, %v39_v12  ;;  %v1538_v21 = vpack.c.bf16 %v34_v16, %v33_v15  ;;  %v262_v38 = vld [vmem:[%s1795_s1] sm:$0xff]  ;;  %v41_v41 = vld [vmem:[%s1792_s0 + $0x10] sm:$0xff]  ;;  %v42_v42 = vld [vmem:[%s1792_s0 + $0x18] sm:$0xff] }
   0x6   :  { %1380 = vmatprep.subr.bf16.mxu1 %v1320_v9  ;;  %1321 = vmatprep.subr.bf16.mxu0 %v1320_v9  ;;  %v1521_v14 = vpack.c.bf16 %v32_v8, %v31_v7  ;;  %v352_v54 = vld [vmem:[%s1795_s1 + $0x8] sm:$0xff]  ;;  %v442_v6 = vld [vmem:[%s1795_s1 + $0x10] sm:$0xff] }
   0x7   :  { %1381 = vmatpush3.bf16.msra.mxu1 %v1320_v9  ;;  %1323 = vmatpush3.bf16.msra.mxu0 %v1320_v9 }
   0x8   :  { %1324 = vmatprep.subr.bf16.mxu1 %v1449_v18  ;;  %1336 = vmatprep.subr.bf16.mxu0 %v1449_v18 }
   0xa   :  { %1207 = vmatmul.mubr.msk.f32.vlgmr.msra.gmra.mrb[0].mxu1 %vm47_vm0, %v44_v13  ;;  %1201 = vmatmul.mubr.msk.f32.vlgmr.msra.gmra.mrb[0].mxu0 %vm47_vm0, %v40_v17 }
   0xb   :  { %1326 = vmatpush3.bf16.msra.mxu1 %v1521_v14  ;;  %1209 = vmatprep.mubr.msk.f32.mxu1 %vm47_vm0, %v45_v19 }
   0xc   :  { %1327 = vmatprep.subr.bf16.mxu1 %v1449_v18  ;;  %1338 = vmatpush3.bf16.msra.mxu0 %v1521_v14 }
   0xd   :  { %1339 = vmatprep.subr.bf16.mxu0 %v1449_v18  ;;  %1203 = vmatprep.mubr.msk.f32.mxu0 %vm47_vm0, %v41_v41 }
   0xe   :  { %1210 = vmatmul.mubr.msk.f32.gmra.mrb[2].mxu1 %vm47_vm0, %v46_v20  ;;  %1204 = vmatmul.mubr.msk.f32.gmra.mrb[2].mxu0 %vm47_vm0, %v42_v42  ;;  %v622_v42 = vld [vmem:[%s1795_s1 + $0x20] sm:$0xff] }
   0xf   :  { %1329 = vmatpush3.bf16.msra.mxu1 %v1538_v21  ;;  %1220 = vmatprep.mubr.msk.f32.mxu1 %vm1450_vm1, %v1451_v22 }
  0x10   :  { %1330 = vmatprep.subr.bf16.mxu1 %v1449_v18  ;;  %1341 = vmatpush3.bf16.msra.mxu0 %v1538_v21 }
  0x11   :  { %1348 = vmatprep.subr.bf16.mxu0 %v1449_v18  ;;  %1242 = vmatprep.mubr.msk.f32.mxu0 %vm1450_vm1, %v1451_v22 }
  0x12   :  { %1221 = vmatmul.mubr.f32.vlgmr.msra.gmra.mrb[4].mxu1 %v1451_v22 }
  0x13   :  { %1332 = vmatpush3.bf16.msra.mxu1 %v1521_v14  ;;  %1231 = vmatprep.mubr.msk.f32.mxu1 %vm1450_vm1, %v1451_v22 }
  0x14   :  { %1333 = vmatprep.subr.bf16.mxu1 %v1449_v18 }
  0x17   :  { %1335 = vmatpush3.bf16.msra.mxu1 %v1538_v21 }
  0x18   :  { %1342 = vmatprep.subr.bf16.mxu1 %v1449_v18 }
  0xdd   :  { %v1562_v23 = vpop.f32.mrb[0].mxu1  ;;  %v1202_v24 = vpop.f32.mrb[0].mxu0 }
  0xde   :  { %v1564_v25 = vpop.f32.mrb[1].mxu1  ;;  %v138_v26 = vpop.f32.mrb[1].mxu0 }
  0xe1   :  { %v1566_v27 = vpop.f32.mrb[2].mxu1  ;;  %v1205_v57 = vpop.f32.mrb[2].mxu0 }
  0xe2   :  { %v1568_v28 = vpop.f32.mrb[3].mxu1  ;;  %v148_v58 = vpop.f32.mrb[3].mxu0 }
  0xe5   :  { %v248_v29 = vpop.f32.mrb[4].mxu1 }
  0xe6   :  { %v252_v30 = vadd.f32 %v248_v29, %v138_v26  ;;  %v1222_v31 = vpop.f32.mrb[5].mxu1  ;;  %v532_v26 = vld [vmem:[%s1795_s1 + $0x18] sm:$0xff] }
  0xe8   :  { %v254_v32 = vsub.f32 0.0, %v252_v30 }
  0xea   :  { %v255_v33 = vmul.f32 1.442695, %v254_v32 }
  0xec   :  { %1385 = vpow2.f32 %v255_v33 }
  0xf6   :  { %v1386_v34 = vpop.eup %1385 }
  0xf7   :  { %v257_v35 = vadd.f32 1.0, %v1386_v34 }
  0xf9   :  { %1387 = vrcp.f32 %v257_v35 }
 0x103   :  { %v1388_v36 = vpop.eup %1387 }
 0x104   :  { %v260_v37 = vmul.f32 0.99, %v1388_v36 }
 0x106   :  { %v261_v39 = vadd.f32 0.005, %v260_v37 }
 0x108   :  { %266 = vst.msk [vmem:[%s1796_s7] sm:$0xff] %vm177_vm2, %v261_v39  ;;  %vm263_vm3 = vcmp.lt.f32.partialorder %v262_v38, %v261_v39  ;;  %v342_v45 = vmul.f32 0.5, %v261_v39 }
 0x109   :  { %v1111_v40 = vsel %vm263_vm3, 1.0, %v1451_v22 }
 0x10a   :  { %267 = vst.msk [vmem:[%s1794_s5 + $0x8] sm:$0xff] %vm177_vm2, %v1111_v40  ;;  %1232 = vmatmul.mubr.msk.f32.vlgmr.msra.gmra.mrb[6].mxu1 %vm177_vm2, %v1111_v40 }
 0x10b   :  { %1344 = vmatpush3.bf16.msra.mxu1 %v1521_v14  ;;  %1253 = vmatprep.mubr.msk.f32.mxu1 %vm1450_vm1, %v1451_v22 }
 0x10c   :  { %1345 = vmatprep.subr.bf16.mxu1 %v1449_v18 }
 0x10f   :  { %1347 = vmatpush3.bf16.msra.mxu1 %v1538_v21 }
 0x110   :  { %1354 = vmatprep.subr.bf16.mxu1 %v1449_v18 }
 0x1dd   :  { %v337_v43 = vpop.f32.mrb[6].mxu1 }
 0x1de   :  { %v341_v44 = vadd.f32 %v1202_v24, %v337_v43  ;;  %v1233_v46 = vpop.f32.mrb[7].mxu1 }
 0x1e0   :  { %v343_v47 = vadd.f32 %v342_v45, %v341_v44  ;;  %v35_v44 = vld [vmem:[%s1797_s4] sm:$0xff]  ;;  %v36_v45 = vld [vmem:[%s1797_s4 + $0x8] sm:$0xff] }
 0x1e1   :  { %v1372_v46 = vpack.c.bf16 %v36_v45, %v35_v44 }
 0x1e2   :  { %v344_v48 = vsub.f32 0.0, %v343_v47 }
 0x1e4   :  { %v345_v49 = vmul.f32 1.442695, %v344_v48 }
 0x1e6   :  { %1389 = vpow2.f32 %v345_v49 }
 0x1f0   :  { %v1390_v50 = vpop.eup %1389 }
 0x1f1   :  { %v347_v51 = vadd.f32 1.0, %v1390_v50 }
 0x1f3   :  { %1391 = vrcp.f32 %v347_v51 }
 0x1fd   :  { %v1392_v52 = vpop.eup %1391 }
 0x1fe   :  { %v350_v53 = vmul.f32 0.99, %v1392_v52 }
 0x200   :  { %v351_v55 = vadd.f32 0.005, %v350_v53 }
 0x202   :  { %356 = vst.msk [vmem:[%s1796_s7 + $0x8] sm:$0xff] %vm177_vm2, %v351_v55  ;;  %vm353_vm4 = vcmp.lt.f32.partialorder %v352_v54, %v351_v55  ;;  %v432_v61 = vmul.f32 0.5, %v351_v55  ;;  %v712_v55 = vld [vmem:[%s1795_s1 + $0x28] sm:$0xff] }
 0x203   :  { %v1113_v56 = vsel %vm353_vm4, 1.0, %v1451_v22 }
 0x204   :  { %357 = vst.msk [vmem:[%s1794_s5 + $0x10] sm:$0xff] %vm177_vm2, %v1113_v56  ;;  %1243 = vmatmul.mubr.msk.f32.vlgmr.msra.gmra.mrb[4].mxu0 %vm177_vm2, %v1113_v56  ;;  %v37_v56 = vld [vmem:[%s1797_s4 + $0x10] sm:$0xff] }
 0x205   :  { %1350 = vmatpush3.bf16.msra.mxu0 %v1521_v14  ;;  %1264 = vmatprep.mubr.msk.f32.mxu0 %vm1450_vm1, %v1451_v22 }
 0x206   :  { %1351 = vmatprep.subr.bf16.mxu0 %v1449_v18 }
 0x209   :  { %1353 = vmatpush3.bf16.msra.mxu0 %v1538_v21 }
 0x20a   :  { %1360 = vmatprep.subr.bf16.mxu0 %v1449_v18 }
 0x2d7   :  { %v427_v59 = vpop.f32.mrb[4].mxu0 }
 0x2d8   :  { %v431_v60 = vadd.f32 %v427_v59, %v148_v58  ;;  %v1244_v62 = vpop.f32.mrb[5].mxu0 }
 0x2da   :  { %v433_v63 = vadd.f32 %v432_v61, %v431_v60  ;;  %v898_v60 = vld [vmem:[%s1796_s7] sm:$0xff]  ;;  %v899_v61 = vld [vmem:[%s1796_s7 + $0x8] sm:$0xff] }
 0x2dc   :  { %v434_v0 = vsub.f32 0.0, %v433_v63 }
 0x2de   :  { %v435_v1 = vmul.f32 1.442695, %v434_v0 }
 0x2e0   :  { %1393 = vpow2.f32 %v435_v1 }
 0x2ea   :  { %v1394_v2 = vpop.eup %1393 }
 0x2eb   :  { %v437_v3 = vadd.f32 1.0, %v1394_v2 }
 0x2ed   :  { %1395 = vrcp.f32 %v437_v3 }
 0x2f7   :  { %v1396_v4 = vpop.eup %1395 }
 0x2f8   :  { %v440_v5 = vmul.f32 0.99, %v1396_v4 }
 0x2fa   :  { %v441_v7 = vadd.f32 0.005, %v440_v5 }
 0x2fc   :  { %446 = vst.msk [vmem:[%s1796_s7 + $0x10] sm:$0xff] %vm177_vm2, %v441_v7  ;;  %vm443_vm5 = vcmp.lt.f32.partialorder %v442_v6, %v441_v7  ;;  %v522_v11 = vmul.f32 0.5, %v441_v7 }
 0x2fd   :  { %v1115_v8 = vsel %vm443_vm5, 1.0, %v1451_v22 }
 0x2fe   :  { %447 = vst.msk [vmem:[%s1794_s5 + $0x18] sm:$0xff] %vm177_vm2, %v1115_v8  ;;  %1254 = vmatmul.mubr.msk.f32.vlgmr.msra.gmra.mrb[8].mxu1 %vm177_vm2, %v1115_v8 }
 0x2ff   :  { %1356 = vmatpush3.bf16.msra.mxu1 %v1521_v14  ;;  %1275 = vmatprep.mubr.msk.f32.mxu1 %vm1450_vm1, %v1451_v22 }
 0x300   :  { %1357 = vmatprep.subr.bf16.mxu1 %v1449_v18 }
 0x303   :  { %1359 = vmatpush3.bf16.msra.mxu1 %v1538_v21  ;;  %v900_v62 = vld [vmem:[%s1796_s7 + $0x10] sm:$0xff] }
 0x304   :  { %1366 = vmatprep.subr.bf16.mxu1 %v1449_v18 }
 0x3d1   :  { %v517_v9 = vpop.f32.mrb[8].mxu1 }
 0x3d2   :  { %v521_v10 = vadd.f32 %v1205_v57, %v517_v9  ;;  %v1255_v12 = vpop.f32.mrb[9].mxu1 }
 0x3d4   :  { %v523_v13 = vadd.f32 %v522_v11, %v521_v10 }
 0x3d6   :  { %v524_v15 = vsub.f32 0.0, %v523_v13 }
 0x3d8   :  { %v525_v16 = vmul.f32 1.442695, %v524_v15 }
 0x3da   :  { %1397 = vpow2.f32 %v525_v16 }
 0x3e4   :  { %v1398_v17 = vpop.eup %1397 }
 0x3e5   :  { %v527_v19 = vadd.f32 1.0, %v1398_v17 }
 0x3e7   :  { %1399 = vrcp.f32 %v527_v19 }
 0x3f1   :  { %v1400_v20 = vpop.eup %1399 }
 0x3f2   :  { %v530_v24 = vmul.f32 0.99, %v1400_v20 }
 0x3f4   :  { %v531_v29 = vadd.f32 0.005, %v530_v24 }
 0x3f6   :  { %536 = vst.msk [vmem:[%s1796_s7 + $0x18] sm:$0xff] %vm177_vm2, %v531_v29  ;;  %vm533_vm6 = vcmp.lt.f32.partialorder %v532_v26, %v531_v29  ;;  %v612_v33 = vmul.f32 0.5, %v531_v29 }
 0x3f7   :  { %v1117_v30 = vsel %vm533_vm6, 1.0, %v1451_v22 }
 0x3f8   :  { %537 = vst.msk [vmem:[%s1794_s5 + $0x20] sm:$0xff] %vm177_vm2, %v1117_v30  ;;  %1265 = vmatmul.mubr.msk.f32.vlgmr.msra.gmra.mrb[6].mxu0 %vm177_vm2, %v1117_v30 }
 0x3f9   :  { %1362 = vmatpush3.bf16.msra.mxu0 %v1521_v14  ;;  %1286 = vmatprep.mubr.msk.f32.mxu0 %vm1450_vm1, %v1451_v22 }
 0x3fa   :  { %1363 = vmatprep.subr.bf16.mxu0 %v1449_v18 }
 0x3fd   :  { %1365 = vmatpush3.bf16.msra.mxu0 %v1538_v21  ;;  %v901_v63 = vld [vmem:[%s1796_s7 + $0x18] sm:$0xff] }
 0x3fe   :  { %1373 = vmatprep.subr.bf16.mxu0 %v1372_v46 }
 0x4cb   :  { %v607_v31 = vpop.f32.mrb[6].mxu0 }
 0x4cc   :  { %v611_v32 = vadd.f32 %v607_v31, %v1564_v25  ;;  %v1266_v34 = vpop.f32.mrb[7].mxu0 }
 0x4ce   :  { %v613_v35 = vadd.f32 %v612_v33, %v611_v32 }
 0x4d0   :  { %v614_v36 = vsub.f32 0.0, %v613_v35 }
 0x4d2   :  { %v615_v37 = vmul.f32 1.442695, %v614_v36 }
 0x4d4   :  { %1401 = vpow2.f32 %v615_v37 }
 0x4de   :  { %v1402_v38 = vpop.eup %1401 }
 0x4df   :  { %v617_v39 = vadd.f32 1.0, %v1402_v38 }
 0x4e1   :  { %1403 = vrcp.f32 %v617_v39 }
 0x4eb   :  { %v1404_v40 = vpop.eup %1403 }
 0x4ec   :  { %v620_v41 = vmul.f32 0.99, %v1404_v40 }
 0x4ee   :  { %v621_v43 = vadd.f32 0.005, %v620_v41 }
 0x4f0   :  { %626 = vst.msk [vmem:[%s1796_s7 + $0x20] sm:$0xff] %vm177_vm2, %v621_v43  ;;  %vm623_vm7 = vcmp.lt.f32.partialorder %v622_v42, %v621_v43  ;;  %v702_v48 = vmul.f32 0.5, %v621_v43 }
 0x4f1   :  { %v1119_v25 = vsel %vm623_vm7, 1.0, %v1451_v22 }
 0x4f2   :  { %627 = vst.msk [vmem:[%s1794_s5 + $0x28] sm:$0xff] %vm177_vm2, %v1119_v25  ;;  %1276 = vmatmul.mubr.msk.f32.vlgmr.msra.gmra.mrb[10].mxu1 %vm177_vm2, %v1119_v25 }
 0x4f3   :  { %1368 = vmatpush3.bf16.msra.mxu1 %v1521_v14  ;;  %1297 = vmatprep.mubr.msk.f32.mxu1 %vm1450_vm1, %v1451_v22 }
 0x4f4   :  { %1369 = vmatprep.subr.bf16.mxu1 %v1449_v18 }
 0x4f7   :  { %1371 = vmatpush3.bf16.msra.mxu1 %v1538_v21  ;;  %v902_v0 = vld [vmem:[%s1796_s7 + $0x20] sm:$0xff] }
 0x5c5   :  { %v697_v47 = vpop.f32.mrb[10].mxu1 }
 0x5c6   :  { %v701_v14 = vadd.f32 %v1562_v23, %v697_v47  ;;  %v1277_v49 = vpop.f32.mrb[11].mxu1  ;;  %v38_v23 = vld [vmem:[%s1797_s4 + $0x18] sm:$0xff] }
 0x5c7   :  { %v1376_v58 = vpack.c.bf16 %v38_v23, %v37_v56 }
 0x5c8   :  { %v703_v50 = vadd.f32 %v702_v48, %v701_v14  ;;  %v802_v48 = vld [vmem:[%s1795_s1 + $0x30] sm:$0xff] }
 0x5ca   :  { %v704_v51 = vsub.f32 0.0, %v703_v50 }
 0x5cc   :  { %v705_v18 = vmul.f32 1.442695, %v704_v51 }
 0x5ce   :  { %1405 = vpow2.f32 %v705_v18 }
 0x5d8   :  { %v1406_v21 = vpop.eup %1405 }
 0x5d9   :  { %v707_v52 = vadd.f32 1.0, %v1406_v21 }
 0x5db   :  { %1407 = vrcp.f32 %v707_v52 }
 0x5e5   :  { %v1408_v53 = vpop.eup %1407 }
 0x5e6   :  { %v710_v54 = vmul.f32 0.99, %v1408_v53 }
 0x5e8   :  { %v711_v57 = vadd.f32 0.005, %v710_v54 }
 0x5ea   :  { %716 = vst.msk [vmem:[%s1796_s7 + $0x28] sm:$0xff] %vm177_vm2, %v711_v57  ;;  %vm713_vm8 = vcmp.lt.f32.partialorder %v712_v55, %v711_v57  ;;  %v792_v4 = vmul.f32 0.5, %v711_v57 }
 0x5eb   :  { %v1121_v59 = vsel %vm713_vm8, 1.0, %v1451_v22 }
 0x5ec   :  { %717 = vst.msk [vmem:[%s1794_s5 + $0x30] sm:$0xff] %vm177_vm2, %v1121_v59  ;;  %1287 = vmatmul.mubr.msk.f32.vlgmr.msra.gmra.mrb[8].mxu0 %vm177_vm2, %v1121_v59 }
 0x5ed   :  { %1375 = vmatpush3.bf16.msra.mxu0 %v1372_v46  ;;  %1308 = vmatprep.mubr.msk.f32.mxu0 %vm177_vm2, %v898_v60 }
 0x5ee   :  { %1377 = vmatprep.subr.bf16.mxu0 %v1376_v58 }
 0x5f1   :  { %1379 = vmatpush3.bf16.msra.mxu0 %v1376_v58  ;;  %v903_v1 = vld [vmem:[%s1796_s7 + $0x28] sm:$0xff] }
 0x5f4   :  { %1309 = vmatmul.mubr.msk.f32.vlgmr.msra.gmra.mrb[10].mxu0 %vm177_vm2, %v899_v61 }
 0x5f5   :  { %1311 = vmatprep.mubr.msk.f32.mxu0 %vm177_vm2, %v900_v62 }
 0x5f8   :  { %1312 = vmatmul.mubr.msk.f32.gmra.mrb[12].mxu0 %vm177_vm2, %v901_v63 }
 0x5f9   :  { %1314 = vmatprep.mubr.msk.f32.mxu0 %vm177_vm2, %v902_v0 }
 0x5fc   :  { %1315 = vmatmul.mubr.msk.f32.gmra.mrb[14].mxu0 %vm177_vm2, %v903_v1 }
 0x6bf   :  { %v787_v2 = vpop.f32.mrb[8].mxu0 }
 0x6c0   :  { %v791_v3 = vadd.f32 %v787_v2, %v1568_v28  ;;  %v1288_v5 = vpop.f32.mrb[9].mxu0  ;;  %v892_v2 = vld [vmem:[%s1795_s1 + $0x38] sm:$0xff] }
 0x6c2   :  { %v793_v6 = vadd.f32 %v792_v4, %v791_v3 }
 0x6c4   :  { %v794_v7 = vsub.f32 0.0, %v793_v6 }
 0x6c6   :  { %v795_v8 = vmul.f32 1.442695, %v794_v7 }
 0x6c7   :  { %v1310_v9 = vpop.f32.mrb[10].mxu0 }
 0x6c8   :  { %1409 = vpow2.f32 %v795_v8  ;;  %v1036_v10 = vsub.f32 0.0, %v1310_v9  ;;  %v996_v11 = vpop.f32.mrb[11].mxu0 }
 0x6c9   :  { %v1035_v12 = vsub.f32 0.0, %v996_v11 }
 0x6ca   :  { %v1045_v13 = vmul.f32 1.442695, %v1036_v10 }
 0x6cb   :  { %v1043_v15 = vmul.f32 1.442695, %v1035_v12  ;;  %v1313_v16 = vpop.f32.mrb[12].mxu0 }
 0x6cc   :  { %1411 = vpow2.f32 %v1045_v13  ;;  %v1038_v17 = vsub.f32 0.0, %v1313_v16  ;;  %v1006_v19 = vpop.f32.mrb[13].mxu0 }
 0x6cd   :  { %1413 = vpow2.f32 %v1043_v15  ;;  %v1037_v20 = vsub.f32 0.0, %v1006_v19 }
 0x6ce   :  { %v1049_v24 = vmul.f32 1.442695, %v1038_v17 }
 0x6cf   :  { %v1047_v28 = vmul.f32 1.442695, %v1037_v20  ;;  %v1316_v26 = vpop.f32.mrb[14].mxu0 }
 0x6d0   :  { %1415 = vpow2.f32 %v1049_v24  ;;  %v1040_v29 = vsub.f32 0.0, %v1316_v26  ;;  %v1016_v30 = vpop.f32.mrb[15].mxu0 }
 0x6d1   :  { %1417 = vpow2.f32 %v1047_v28  ;;  %v1039_v31 = vsub.f32 0.0, %v1016_v30 }
 0x6d2   :  { %v1410_v32 = vpop.eup %1409  ;;  %v1053_v33 = vmul.f32 1.442695, %v1040_v29 }
 0x6d3   :  { %v797_v34 = vadd.f32 1.0, %v1410_v32  ;;  %v1051_v35 = vmul.f32 1.442695, %v1039_v31 }
 0x6d4   :  { %1419 = vpow2.f32 %v1053_v33 }
 0x6d5   :  { %1421 = vrcp.f32 %v797_v34 }
 0x6d6   :  { %v1412_v36 = vpop.eup %1411  ;;  %1423 = vpow2.f32 %v1051_v35 }
 0x6d7   :  { %v1414_v37 = vpop.eup %1413  ;;  %v1060_v38 = vadd.f32 1.0, %v1412_v36 }
 0x6d8   :  { %v1059_v39 = vadd.f32 1.0, %v1414_v37 }
 0x6d9   :  { %1425 = vrcp.f32 %v1060_v38 }
 0x6da   :  { %v1416_v40 = vpop.eup %1415  ;;  %1427 = vrcp.f32 %v1059_v39 }
 0x6db   :  { %v1418_v41 = vpop.eup %1417  ;;  %v1062_v42 = vadd.f32 1.0, %v1416_v40 }
 0x6dc   :  { %v1061_v43 = vadd.f32 1.0, %v1418_v41 }
 0x6dd   :  { %1429 = vrcp.f32 %v1062_v42 }
 0x6de   :  { %v1420_v25 = vpop.eup %1419  ;;  %1431 = vrcp.f32 %v1061_v43 }
 0x6df   :  { %v1422_v44 = vpop.eup %1421  ;;  %v1064_v45 = vadd.f32 1.0, %v1420_v25 }
 0x6e0   :  { %v1424_v46 = vpop.eup %1423  ;;  %v800_v47 = vmul.f32 0.99, %v1422_v44 }
 0x6e1   :  { %1433 = vrcp.f32 %v1064_v45  ;;  %v1063_v14 = vadd.f32 1.0, %v1424_v46 }
 0x6e2   :  { %v801_v49 = vadd.f32 0.005, %v800_v47 }
 0x6e3   :  { %v1426_v50 = vpop.eup %1425  ;;  %1435 = vrcp.f32 %v1063_v14 }
 0x6e4   :  { %v1428_v51 = vpop.eup %1427  ;;  %806 = vst.msk [vmem:[%s1796_s7 + $0x30] sm:$0xff] %vm177_vm2, %v801_v49  ;;  %1084 = vst.msk [vmem:[%s1798_s6 + $0x8] sm:$0xff] %vm177_vm2, %v1426_v50  ;;  %vm803_vm9 = vcmp.lt.f32.partialorder %v802_v48, %v801_v49  ;;  %v882_v57 = vmul.f32 0.5, %v801_v49 }
 0x6e5   :  { %1083 = vst.msk [vmem:[%s1798_s6] sm:$0xff] %vm177_vm2, %v1428_v51  ;;  %v1123_v18 = vsel %vm803_vm9, 1.0, %v1451_v22 }
 0x6e6   :  { %807 = vst.msk [vmem:[%s1794_s5 + $0x38] sm:$0xff] %vm177_vm2, %v1123_v18  ;;  %1298 = vmatmul.mubr.msk.f32.vlgmr.msra.gmra.mrb[12].mxu1 %vm177_vm2, %v1123_v18 }
 0x6e7   :  { %v1430_v21 = vpop.eup %1429 }
 0x6e8   :  { %v1432_v52 = vpop.eup %1431  ;;  %1086 = vst.msk [vmem:[%s1798_s6 + $0x18] sm:$0xff] %vm177_vm2, %v1430_v21 }
 0x6e9   :  { %1085 = vst.msk [vmem:[%s1798_s6 + $0x10] sm:$0xff] %vm177_vm2, %v1432_v52 }
 0x6eb   :  { %v1434_v53 = vpop.eup %1433  ;;  %v904_v54 = vld [vmem:[%s1796_s7 + $0x30] sm:$0xff] }
 0x6ec   :  { %1088 = vst.msk [vmem:[%s1798_s6 + $0x28] sm:$0xff] %vm177_vm2, %v1434_v53  ;;  %1317 = vmatprep.mubr.msk.f32.mxu0 %vm177_vm2, %v904_v54 }
 0x6ed   :  { %v1436_v55 = vpop.eup %1435 }
 0x6ee   :  { %1087 = vst.msk [vmem:[%s1798_s6 + $0x20] sm:$0xff] %vm177_vm2, %v1436_v55 }
 0x7b9   :  { %v877_v56 = vpop.f32.mrb[12].mxu1 }
 0x7ba   :  { %v881_v23 = vadd.f32 %v1566_v27, %v877_v56  ;;  %v1299_v58 = vpop.f32.mrb[13].mxu1 }
 0x7bc   :  { %v883_v59 = vadd.f32 %v882_v57, %v881_v23 }
 0x7be   :  { %v884_v60 = vsub.f32 0.0, %v883_v59 }
 0x7c0   :  { %v885_v61 = vmul.f32 1.442695, %v884_v60 }
 0x7c2   :  { %1437 = vpow2.f32 %v885_v61 }
 0x7cc   :  { %v1438_v62 = vpop.eup %1437 }
 0x7cd   :  { %v887_v63 = vadd.f32 1.0, %v1438_v62 }
 0x7cf   :  { %1439 = vrcp.f32 %v887_v63 }
 0x7d9   :  { %v1440_v0 = vpop.eup %1439 }
 0x7da   :  { %v890_v1 = vmul.f32 0.99, %v1440_v0 }
 0x7dc   :  { %v891_v3 = vadd.f32 0.005, %v890_v1 }
 0x7de   :  { %vm893_vm10 = vcmp.lt.f32.partialorder %v892_v2, %v891_v3  ;;  %896 = vst.msk [vmem:[%s1796_s7 + $0x38] sm:$0xff] %vm177_vm2, %v891_v3 }
 0x7df   :  { %v1125_v27 = vsel %vm893_vm10, 1.0, %v1451_v22 }
 0x7e0   :  { %897 = vst.msk [vmem:[%s1794_s5 + $0x40] sm:$0xff] %vm177_vm2, %v1125_v27 }
 0x7e5   :  { %v905_v4 = vld [vmem:[%s1796_s7 + $0x38] sm:$0xff] }
 0x7e6   :  { %1318 = vmatmul.mubr.msk.f32.gmra.mrb[16].mxu0 %vm177_vm2, %v905_v4 }
 0x8b9   :  { %v1319_v5 = vpop.f32.mrb[16].mxu0 }
 0x8ba   :  { %v1042_v6 = vsub.f32 0.0, %v1319_v5  ;;  %v1026_v7 = vpop.f32.mrb[17].mxu0 }
 0x8bb   :  { %v1041_v8 = vsub.f32 0.0, %v1026_v7 }
 0x8bc   :  { %v1057_v9 = vmul.f32 1.442695, %v1042_v6 }
 0x8bd   :  { %v1055_v10 = vmul.f32 1.442695, %v1041_v8 }
 0x8be   :  { %1441 = vpow2.f32 %v1057_v9 }
 0x8bf   :  { %1443 = vpow2.f32 %v1055_v10 }
 0x8c8   :  { %v1442_v22 = vpop.eup %1441 }
 0x8c9   :  { %v1444_v11 = vpop.eup %1443  ;;  %v1066_v12 = vadd.f32 1.0, %v1442_v22 }
 0x8ca   :  { %v1065_v13 = vadd.f32 1.0, %v1444_v11 }
 0x8cb   :  { %1445 = vrcp.f32 %v1066_v12 }
 0x8cc   :  { %1447 = vrcp.f32 %v1065_v13 }
 0x8d5   :  { %v1446_v15 = vpop.eup %1445 }
 0x8d6   :  { %v1448_v16 = vpop.eup %1447  ;;  %1090 = vst.msk [vmem:[%s1798_s6 + $0x38] sm:$0xff] %vm177_vm2, %v1446_v15 }
 0x8d7   :  { %1089 = vst.msk [vmem:[%s1798_s6 + $0x30] sm:$0xff] %vm177_vm2, %v1448_v16 }

</bundles_post_ra>
